<compile_context>
chip_gen: v7x
topology: tpu7x:2x2x1
jax: 0.10.0
libtpu: 0.0.40
codegen_flags: <defaults>
</compile_context>

<pallas_src>
import jax
import jax.numpy as jnp
from jax import lax
from jax.experimental import pallas as pl
from jax.experimental.pallas import tpu as pltpu


def _round_up(n, m):
    return ((n + m - 1) // m) * m


def _cdiv(a, b):
    return -(-a // b)


def _mlp_kernel(
    x_ref,
    w1_ref, b1_ref,
    w2_ref, b2_ref,
    w3_ref, b3_ref,
    w4_ref, b4_ref,
    w5_ref, b5_ref,
    o_ref,
):
    # x tile: (TB, input_dim), native dtype; cast to bf16 in-kernel (VPU slack).
    x = x_ref[...].astype(jnp.bfloat16)

    h = jnp.dot(x, w1_ref[...], preferred_element_type=jnp.float32) + b1_ref[...]
    h = jnp.maximum(h, 0.0).astype(jnp.bfloat16)                      # (TB, 256)

    h = jnp.dot(h, w2_ref[...], preferred_element_type=jnp.float32) + b2_ref[...]
    h = jnp.maximum(h, 0.0).astype(jnp.bfloat16)                      # (TB, 128)

    h = jnp.dot(h, w3_ref[...], preferred_element_type=jnp.float32) + b3_ref[...]
    h = jnp.maximum(h, 0.0).astype(jnp.bfloat16)                      # (TB, 128) cols 64+ are 0

    h = jnp.dot(h, w4_ref[...], preferred_element_type=jnp.float32) + b4_ref[...]
    h = jnp.maximum(h, 0.0)                                           # (TB, 128) f32, cols 32+ are 0

    # Final Linear(32, 1), lane-dense: contract the (zero-padded) feature axis of
    # h against the w5 row -> (1, TB). Same dimension_numbers as the q @ k^T
    # pattern, so batch lands on lanes with no separate transpose.
    row = lax.dot_general(
        w5_ref[...], h,
        dimension_numbers=(((1,), (1,)), ((), ())),
        preferred_element_type=jnp.float32,
    )                                                                  # (1, TB)
    o_ref[...] = (row + b5_ref[...]).reshape(o_ref.shape)              # (1, 1, TB)


def prepare_params(params, eps=1e-5):
    """One-time fold of eval-mode BatchNorm into the preceding Linear, zero-pad
    of the narrow tail layers to 128 lanes, and bf16 cast of matmul weights.

    Returns the tuple of kernel weight/bias arguments (everything except x).
    Call once and reuse across forward calls.
    """
    def bn_fold(w, b, gamma, beta, rmean, rvar):
        scale = gamma / jnp.sqrt(rvar + eps)
        return w * scale[None, :], (b - rmean) * scale + beta

    w1, b1 = bn_fold(params["w1"], params["b1"],
                     params["bn1_g"], params["bn1_b"], params["bn1_m"], params["bn1_v"])
    w2, b2 = bn_fold(params["w2"], params["b2"],
                     params["bn2_g"], params["bn2_b"], params["bn2_m"], params["bn2_v"])
    w3, b3 = bn_fold(params["w3"], params["b3"],
                     params["bn3_g"], params["bn3_b"], params["bn3_m"], params["bn3_v"])

    # Zero-pad the narrow layers (64 / 32 features) out to 128 lanes: padded
    # columns carry zero weight + zero bias, stay zero through ReLU, and the
    # next layer's padded rows / w5's padded entries are also zero, so the
    # result is identical to the unpadded network.
    PAD = 128
    w3 = jnp.pad(w3, ((0, 0), (0, PAD - w3.shape[1])))
    b3 = jnp.pad(b3, ((0, PAD - b3.shape[0]),))
    w4 = jnp.pad(params["w4"], ((0, PAD - params["w4"].shape[0]),
                                (0, PAD - params["w4"].shape[1])))
    b4 = jnp.pad(params["b4"], ((0, PAD - params["b4"].shape[0]),))
    w5 = jnp.pad(params["w5"].reshape(-1), ((0, PAD - params["w5"].shape[0]),))

    row = lambda b: b.reshape(1, -1).astype(jnp.float32)
    return (
        w1.astype(jnp.bfloat16), row(b1),
        w2.astype(jnp.bfloat16), row(b2),
        w3.astype(jnp.bfloat16), row(b3),
        w4.astype(jnp.bfloat16), row(b4),
        w5.reshape(1, -1).astype(jnp.float32),            # (1, 128) row, f32
        params["b5"].reshape(1, 1).astype(jnp.float32),   # (1, 1)
    )


def neural_net_forward(x, prepped_params, *, block_batch=1024):
    """x: (B, input_dim). prepped_params: output of prepare_params()."""
    B, in_dim = x.shape
    block_batch = max(16, _round_up(block_batch, 16))

    # Batch tile: multiple of 16 (bf16 sublane packing), capped at block_batch,
    # and sized ~B/2 when B is small so there are >=2 grid steps (v7x 2-TC).
    # For tiny B a single full-array block is used (block dims == array dims).
    if B <= 16:
        tb = B
    else:
        tb = min(block_batch, _round_up(_cdiv(B, 2), 16))
    num_tiles = _cdiv(B, tb)

    def resident(a):
        nd = a.ndim
        return pl.BlockSpec(a.shape, lambda i, _n=nd: (0,) * _n)

    grid_spec = pl.GridSpec(
        grid=(num_tiles,),
        in_specs=[pl.BlockSpec((tb, in_dim), lambda i: (i, 0))]
                 + [resident(a) for a in prepped_params],
        # Lane-dense output: one (1, TB) row per grid step.
        out_specs=pl.BlockSpec((1, 1, tb), lambda i: (i, 0, 0)),
    )

    flops = 2 * B * (in_dim * 256 + 256 * 128 + 128 * 128 + 128 * 128 + 128)
    bytes_accessed = (
        int(x.size) * x.dtype.itemsize
        + B * 4
        + sum(int(a.size) * a.dtype.itemsize for a in prepped_params)
    )

    out = pl.pallas_call(
        _mlp_kernel,
        out_shape=jax.ShapeDtypeStruct((num_tiles, 1, tb), jnp.float32),
        grid_spec=grid_spec,
        compiler_params=pltpu.CompilerParams(
            dimension_semantics=("parallel",),   # batch tiles independent
        ),
        cost_estimate=pl.CostEstimate(
            flops=flops, transcendentals=0, bytes_accessed=bytes_accessed),
    )(x, *prepped_params)

    # Tail rows of a ragged last block are garbage-in/garbage-out and are
    # discarded here (rows are independent; no cross-batch reduction in-kernel).
    return out.reshape(-1)[:B].reshape(B, 1)


def init_params(key, input_dim):
    """Deterministic synthetic init matching the PyTorch module's shapes.

    Linear weights are stored transposed, i.e. (in_features, out_features).
    BatchNorm: gamma=1, beta=0, running_mean=0, running_var=1 (PyTorch defaults).
    """
    dims = [(input_dim, 256), (256, 128), (128, 64), (64, 32), (32, 1)]
    params = {}
    keys = jax.random.split(key, 2 * len(dims))
    for i, (fan_in, fan_out) in enumerate(dims):
        bound = 1.0 / jnp.sqrt(fan_in)
        params[f"w{i+1}"] = jax.random.uniform(
            keys[2 * i], (fan_in, fan_out), jnp.float32, -bound, bound
        )
        params[f"b{i+1}"] = jax.random.uniform(
            keys[2 * i + 1], (fan_out,), jnp.float32, -bound, bound
        )
    for j, width in enumerate((256, 128, 64), start=1):
        params[f"bn{j}_g"] = jnp.ones((width,), jnp.float32)
        params[f"bn{j}_b"] = jnp.zeros((width,), jnp.float32)
        params[f"bn{j}_m"] = jnp.zeros((width,), jnp.float32)
        params[f"bn{j}_v"] = jnp.ones((width,), jnp.float32)
    return params


def _reference_forward(x, params):
    """Pure-JAX f32 reference (eval-mode semantics) for correctness checking."""
    eps = 1e-5

    def bn(h, g, b, m, v):
        return (h - m) / jnp.sqrt(v + eps) * g + b

    h = x @ params["w1"] + params["b1"]
    h = jnp.maximum(bn(h, params["bn1_g"], params["bn1_b"], params["bn1_m"], params["bn1_v"]), 0.0)
    h = h @ params["w2"] + params["b2"]
    h = jnp.maximum(bn(h, params["bn2_g"], params["bn2_b"], params["bn2_m"], params["bn2_v"]), 0.0)
    h = h @ params["w3"] + params["b3"]
    h = jnp.maximum(bn(h, params["bn3_g"], params["bn3_b"], params["bn3_m"], params["bn3_v"]), 0.0)
    h = jnp.maximum(h @ params["w4"] + params["b4"], 0.0)
    return h @ params["w5"] + params["b5"]


if __name__ == "__main__":
    INPUT_DIM = 32

    key = jax.random.PRNGKey(0)
    k_params, k_x1, k_x2 = jax.random.split(key, 3)
    params = init_params(k_params, INPUT_DIM)
    prepped = prepare_params(params)   # fold BN + pad + bf16 cast once, reused below

    # Small demo batch (single full-array block).
    x_small = jax.random.normal(k_x1, (8, INPUT_DIM), jnp.float32)
    out_small = jax.block_until_ready(neural_net_forward(x_small, prepped))
    ref_small = _reference_forward(x_small, params)
    assert out_small.shape == (8, 1), out_small.shape
    assert jnp.allclose(out_small, ref_small, atol=2e-2, rtol=2e-2), "mismatch (small batch)"

    # Larger batch exercises multi-tile grid (2 steps), the ragged last block,
    # and the lane-dense output path.
    x_big = jax.random.normal(k_x2, (300, INPUT_DIM), jnp.float32)
    out_big = jax.block_until_ready(neural_net_forward(x_big, prepped))
    ref_big = _reference_forward(x_big, params)
    assert out_big.shape == (300, 1), out_big.shape
    assert jnp.allclose(out_big, ref_big, atol=2e-2, rtol=2e-2), "mismatch (large batch)"

    print("KERNEL_OK")
</pallas_src>

<mosaic_0001>
module attributes {stable_mosaic.version = 11 : i64} {
  func.func @_mlp_kernel(%arg0: i32, %arg1: memref<8x32xf32, #tpu.memory_space<vmem>>, %arg2: memref<32x256xbf16, #tpu.memory_space<vmem>>, %arg3: memref<1x256xf32, #tpu.memory_space<vmem>>, %arg4: memref<256x128xbf16, #tpu.memory_space<vmem>>, %arg5: memref<1x128xf32, #tpu.memory_space<vmem>>, %arg6: memref<128x128xbf16, #tpu.memory_space<vmem>>, %arg7: memref<1x128xf32, #tpu.memory_space<vmem>>, %arg8: memref<128x128xbf16, #tpu.memory_space<vmem>>, %arg9: memref<1x128xf32, #tpu.memory_space<vmem>>, %arg10: memref<1x128xf32, #tpu.memory_space<vmem>>, %arg11: memref<1x1xf32, #tpu.memory_space<vmem>>, %arg12: memref<1x1x8xf32, #tpu.memory_space<vmem>>) attributes {dimension_semantics = [#tpu.dimension_semantics<parallel>], iteration_bounds = array<i64: 1>, scalar_prefetch = 0 : i64, scratch_operands = 0 : i64, tpu.core_type = #tpu.core_type<tc>, window_params = [{transform_indices = @transform_0, window_bounds = array<i64: 8, 32>}, {pipeline_mode = #tpu.pipeline_mode<synchronous>, transform_indices = @transform_1, window_bounds = array<i64: 32, 256>}, {pipeline_mode = #tpu.pipeline_mode<synchronous>, transform_indices = @transform_2, window_bounds = array<i64: 1, 256>}, {pipeline_mode = #tpu.pipeline_mode<synchronous>, transform_indices = @transform_3, window_bounds = array<i64: 256, 128>}, {pipeline_mode = #tpu.pipeline_mode<synchronous>, transform_indices = @transform_4, window_bounds = array<i64: 1, 128>}, {pipeline_mode = #tpu.pipeline_mode<synchronous>, transform_indices = @transform_5, window_bounds = array<i64: 128, 128>}, {pipeline_mode = #tpu.pipeline_mode<synchronous>, transform_indices = @transform_6, window_bounds = array<i64: 1, 128>}, {pipeline_mode = #tpu.pipeline_mode<synchronous>, transform_indices = @transform_7, window_bounds = array<i64: 128, 128>}, {pipeline_mode = #tpu.pipeline_mode<synchronous>, transform_indices = @transform_8, window_bounds = array<i64: 1, 128>}, {pipeline_mode = #tpu.pipeline_mode<synchronous>, transform_indices = @transform_9, window_bounds = array<i64: 1, 128>}, {pipeline_mode = #tpu.pipeline_mode<synchronous>, transform_indices = @transform_10, window_bounds = array<i64: 1, 1>}, {transform_indices = @transform_11, window_bounds = array<i64: 1, 1, 8>}]} {
    %c0 = arith.constant 0 : index
    %c0_0 = arith.constant 0 : index
    %0 = vector.load %arg1[%c0, %c0_0] : memref<8x32xf32, #tpu.memory_space<vmem>>, vector<8x32xf32>
    %1 = arith.truncf %0 : vector<8x32xf32> to vector<8x32xbf16>
    %c0_1 = arith.constant 0 : index
    %c0_2 = arith.constant 0 : index
    %2 = vector.load %arg2[%c0_1, %c0_2] : memref<32x256xbf16, #tpu.memory_space<vmem>>, vector<32x256xbf16>
    %cst = arith.constant dense<0.000000e+00> : vector<8x256xf32>
    %3 = tpu.matmul %1, %2, %cst {dimension_numbers = #tpu.dot_dimension_numbers<[1], [0], [0], [1], [0, 0, 1, 1], [], []>} : vector<8x32xbf16>, vector<32x256xbf16>, vector<8x256xf32> -> vector<8x256xf32>
    %c0_3 = arith.constant 0 : index
    %c0_4 = arith.constant 0 : index
    %4 = vector.load %arg3[%c0_3, %c0_4] : memref<1x256xf32, #tpu.memory_space<vmem>>, vector<1x256xf32>
    %5 = vector.broadcast %4 : vector<1x256xf32> to vector<8x256xf32>
    %6 = arith.addf %3, %5 : vector<8x256xf32>
    %cst_5 = arith.constant 0.000000e+00 : f32
    %7 = vector.broadcast %cst_5 : f32 to vector<8x256xf32>
    %8 = arith.maximumf %6, %7 : vector<8x256xf32>
    %9 = arith.truncf %8 : vector<8x256xf32> to vector<8x256xbf16>
    %c0_6 = arith.constant 0 : index
    %c0_7 = arith.constant 0 : index
    %10 = vector.load %arg4[%c0_6, %c0_7] : memref<256x128xbf16, #tpu.memory_space<vmem>>, vector<256x128xbf16>
    %cst_8 = arith.constant dense<0.000000e+00> : vector<8x128xf32>
    %11 = tpu.matmul %9, %10, %cst_8 {dimension_numbers = #tpu.dot_dimension_numbers<[1], [0], [0], [1], [0, 0, 1, 1], [], []>} : vector<8x256xbf16>, vector<256x128xbf16>, vector<8x128xf32> -> vector<8x128xf32>
    %c0_9 = arith.constant 0 : index
    %c0_10 = arith.constant 0 : index
    %12 = vector.load %arg5[%c0_9, %c0_10] : memref<1x128xf32, #tpu.memory_space<vmem>>, vector<1x128xf32>
    %13 = vector.broadcast %12 : vector<1x128xf32> to vector<8x128xf32>
    %14 = arith.addf %11, %13 : vector<8x128xf32>
    %cst_11 = arith.constant 0.000000e+00 : f32
    %15 = vector.broadcast %cst_11 : f32 to vector<8x128xf32>
    %16 = arith.maximumf %14, %15 : vector<8x128xf32>
    %17 = arith.truncf %16 : vector<8x128xf32> to vector<8x128xbf16>
    %c0_12 = arith.constant 0 : index
    %c0_13 = arith.constant 0 : index
    %18 = vector.load %arg6[%c0_12, %c0_13] : memref<128x128xbf16, #tpu.memory_space<vmem>>, vector<128x128xbf16>
    %cst_14 = arith.constant dense<0.000000e+00> : vector<8x128xf32>
    %19 = tpu.matmul %17, %18, %cst_14 {dimension_numbers = #tpu.dot_dimension_numbers<[1], [0], [0], [1], [0, 0, 1, 1], [], []>} : vector<8x128xbf16>, vector<128x128xbf16>, vector<8x128xf32> -> vector<8x128xf32>
    %c0_15 = arith.constant 0 : index
    %c0_16 = arith.constant 0 : index
    %20 = vector.load %arg7[%c0_15, %c0_16] : memref<1x128xf32, #tpu.memory_space<vmem>>, vector<1x128xf32>
    %21 = vector.broadcast %20 : vector<1x128xf32> to vector<8x128xf32>
    %22 = arith.addf %19, %21 : vector<8x128xf32>
    %cst_17 = arith.constant 0.000000e+00 : f32
    %23 = vector.broadcast %cst_17 : f32 to vector<8x128xf32>
    %24 = arith.maximumf %22, %23 : vector<8x128xf32>
    %25 = arith.truncf %24 : vector<8x128xf32> to vector<8x128xbf16>
    %c0_18 = arith.constant 0 : index
    %c0_19 = arith.constant 0 : index
    %26 = vector.load %arg8[%c0_18, %c0_19] : memref<128x128xbf16, #tpu.memory_space<vmem>>, vector<128x128xbf16>
    %cst_20 = arith.constant dense<0.000000e+00> : vector<8x128xf32>
    %27 = tpu.matmul %25, %26, %cst_20 {dimension_numbers = #tpu.dot_dimension_numbers<[1], [0], [0], [1], [0, 0, 1, 1], [], []>} : vector<8x128xbf16>, vector<128x128xbf16>, vector<8x128xf32> -> vector<8x128xf32>
    %c0_21 = arith.constant 0 : index
    %c0_22 = arith.constant 0 : index
    %28 = vector.load %arg9[%c0_21, %c0_22] : memref<1x128xf32, #tpu.memory_space<vmem>>, vector<1x128xf32>
    %29 = vector.broadcast %28 : vector<1x128xf32> to vector<8x128xf32>
    %30 = arith.addf %27, %29 : vector<8x128xf32>
    %cst_23 = arith.constant 0.000000e+00 : f32
    %31 = vector.broadcast %cst_23 : f32 to vector<8x128xf32>
    %32 = arith.maximumf %30, %31 : vector<8x128xf32>
    %c0_24 = arith.constant 0 : index
    %c0_25 = arith.constant 0 : index
    %33 = vector.load %arg10[%c0_24, %c0_25] : memref<1x128xf32, #tpu.memory_space<vmem>>, vector<1x128xf32>
    %cst_26 = arith.constant dense<0.000000e+00> : vector<1x8xf32>
    %34 = tpu.matmul %33, %32, %cst_26 {dimension_numbers = #tpu.dot_dimension_numbers<[1], [1], [0], [0], [0, 0, 1, 0], [], []>} : vector<1x128xf32>, vector<8x128xf32>, vector<1x8xf32> -> vector<1x8xf32>
    %c0_27 = arith.constant 0 : index
    %c0_28 = arith.constant 0 : index
    %35 = vector.load %arg11[%c0_27, %c0_28] : memref<1x1xf32, #tpu.memory_space<vmem>>, vector<1x1xf32>
    %36 = vector.broadcast %35 : vector<1x1xf32> to vector<1x8xf32>
    %37 = arith.addf %34, %36 : vector<1x8xf32>
    %38 = vector.shape_cast %37 : vector<1x8xf32> to vector<1x1x8xf32>
    %c0_29 = arith.constant 0 : index
    %c0_30 = arith.constant 0 : index
    %c0_31 = arith.constant 0 : index
    %39 = vector.load %arg12[%c0_29, %c0_30, %c0_31] : memref<1x1x8xf32, #tpu.memory_space<vmem>>, vector<1x1x8xf32>
    tpu.vector_store %arg12[%c0_29, %c0_30, %c0_31], %38 {strides = array<i32>} : memref<1x1x8xf32, #tpu.memory_space<vmem>>, vector<1x1x8xf32>,
    return
  }
  func.func @transform_0(%arg0: i32) -> (i32, i32) {
    %c0_i32 = arith.constant 0 : i32
    %c0_i32_0 = arith.constant 0 : i32
    return %arg0, %c0_i32 : i32, i32
  }
  func.func @transform_1(%arg0: i32) -> (i32, i32) {
    %c0_i32 = arith.constant 0 : i32
    %c0_i32_0 = arith.constant 0 : i32
    %c0_i32_1 = arith.constant 0 : i32
    return %c0_i32, %c0_i32_0 : i32, i32
  }
  func.func @transform_2(%arg0: i32) -> (i32, i32) {
    %c0_i32 = arith.constant 0 : i32
    %c0_i32_0 = arith.constant 0 : i32
    %c0_i32_1 = arith.constant 0 : i32
    return %c0_i32, %c0_i32_0 : i32, i32
  }
  func.func @transform_3(%arg0: i32) -> (i32, i32) {
    %c0_i32 = arith.constant 0 : i32
    %c0_i32_0 = arith.constant 0 : i32
    %c0_i32_1 = arith.constant 0 : i32
    return %c0_i32, %c0_i32_0 : i32, i32
  }
  func.func @transform_4(%arg0: i32) -> (i32, i32) {
    %c0_i32 = arith.constant 0 : i32
    %c0_i32_0 = arith.constant 0 : i32
    %c0_i32_1 = arith.constant 0 : i32
    return %c0_i32, %c0_i32_0 : i32, i32
  }
  func.func @transform_5(%arg0: i32) -> (i32, i32) {
    %c0_i32 = arith.constant 0 : i32
    %c0_i32_0 = arith.constant 0 : i32
    %c0_i32_1 = arith.constant 0 : i32
    return %c0_i32, %c0_i32_0 : i32, i32
  }
  func.func @transform_6(%arg0: i32) -> (i32, i32) {
    %c0_i32 = arith.constant 0 : i32
    %c0_i32_0 = arith.constant 0 : i32
    %c0_i32_1 = arith.constant 0 : i32
    return %c0_i32, %c0_i32_0 : i32, i32
  }
  func.func @transform_7(%arg0: i32) -> (i32, i32) {
    %c0_i32 = arith.constant 0 : i32
    %c0_i32_0 = arith.constant 0 : i32
    %c0_i32_1 = arith.constant 0 : i32
    return %c0_i32, %c0_i32_0 : i32, i32
  }
  func.func @transform_8(%arg0: i32) -> (i32, i32) {
    %c0_i32 = arith.constant 0 : i32
    %c0_i32_0 = arith.constant 0 : i32
    %c0_i32_1 = arith.constant 0 : i32
    return %c0_i32, %c0_i32_0 : i32, i32
  }
  func.func @transform_9(%arg0: i32) -> (i32, i32) {
    %c0_i32 = arith.constant 0 : i32
    %c0_i32_0 = arith.constant 0 : i32
    %c0_i32_1 = arith.constant 0 : i32
    return %c0_i32, %c0_i32_0 : i32, i32
  }
  func.func @transform_10(%arg0: i32) -> (i32, i32) {
    %c0_i32 = arith.constant 0 : i32
    %c0_i32_0 = arith.constant 0 : i32
    %c0_i32_1 = arith.constant 0 : i32
    return %c0_i32, %c0_i32_0 : i32, i32
  }
  func.func @transform_11(%arg0: i32) -> (i32, i32, i32) {
    %c0_i32 = arith.constant 0 : i32
    %c0_i32_0 = arith.constant 0 : i32
    %c0_i32_1 = arith.constant 0 : i32
    return %arg0, %c0_i32, %c0_i32_0 : i32, i32, i32
  }
}

</mosaic_0001>

<bundles_post_ra>
// kernel: tpu_custom_call.1
= control target key start
LH: loop header
LB: loop body
LE: loop exit
PB: predicated region body
PF: predicated region fallthrough
CT: control target
= control target key end

     0   :  { %s1219_s0 = inlined_call_operand.hbm [shape: f32[8,32], index: 0, kind: input, shape index: {}]   ;;  %s1220_s1 = inlined_call_operand.hbm [shape: bf16[32,256], index: 1, kind: input, shape index: {}]   ;;  %s1221_s2 = inlined_call_operand.vmem [shape: f32[1,256], index: 2, kind: input, shape index: {}]   ;;  %s1222_s3 = inlined_call_operand.hbm [shape: bf16[256,128], index: 3, kind: input, shape index: {}]   ;;  %s1223_s4 = inlined_call_operand.vmem [shape: f32[1,128], index: 4, kind: input, shape index: {}]   ;;  %s1224_s5 = inlined_call_operand.hbm [shape: bf16[128,128], index: 5, kind: input, shape index: {}]   ;;  %s1225_s6 = inlined_call_operand.vmem [shape: f32[1,128], index: 6, kind: input, shape index: {}]   ;;  %s1226_s7 = inlined_call_operand.hbm [shape: bf16[128,128], index: 7, kind: input, shape index: {}]   ;;  %s1227_s8 = inlined_call_operand.vmem [shape: f32[1,128], index: 8, kind: input, shape index: {}]   ;;  %s1228_s9 = inlined_call_operand.vmem [shape: f32[1,128], index: 9, kind: input, shape index: {}]   ;;  %s1229_s10 = inlined_call_operand.<no memory space> [shape: f32[1,1], index: 10, kind: input, shape index: {}]   ;;  %s1230_s11 = inlined_call_operand.hbm [shape: f32[1,1,8], index: 11, kind: output, shape index: {}]  }
   0x1   :  { %v16_v0 = vstv %s1229_s10 }
   0x2   :  { %17 = vst [vmem:[#allocation2] sm:$0x1] %v16_v0 }
   0x3   :  { %18 = vsyncpa [#allocation4], 0 }
   0x4   :  { %19 = vsyncpa [#allocation7], 0 }
   0x5   :  { %20 = vsyncpa [#allocation10], 0 }
   0x6   :  { %21 = vsyncpa [#allocation5], 0  ;;  %s1016_s19 = smov [#allocation6]   ;;  %s876_s23 = scalar_lea.hbm %s1220_s1, 512 }
   0x7   :  { %s37_s20 = sshll.u32 %s1016_s19, 4  ;;  %p877_p0 = scmp.ne.s32.totalorder %s1220_s1, %s876_s23  ;;  %s38_s20 = int_to_ptr.vmem [resolvable:$true] %s37_s20 }
   0x8   :  { %p880_p1 = scmp.lt.u32.totalorder %s876_s23, %s1220_s1 }
   0xa   :  { %p882_p2 = pnand %p880_p1, %p877_p0 }
   0xc   :  { %885 = shalt.err (!%p882_p2)
}
   0xd   :  { %s886_s10 = scalar_lea.vmem %s38_s20, 512  ;;  %p891_p4 = scmp.lt.s32.totalorder %s38_s20, %s38_s20 }
   0xe   :  { %p887_p3 = scmp.ne.s32.totalorder %s38_s20, %s886_s10  ;;  %p892_p5 = scmp.lt.s32.totalorder %s886_s10, %s886_s10 }
  0x10   :  { %p893_p6 = por %p892_p5, %p891_p4 }
  0x12   :  { %p894_p7 = pnand %p893_p6, %p887_p3 }
  0x14   :  { %897 = shalt.err (!%p894_p7)
}
  0x15   :  { %s1017_s28 = smov 128   ;;  %s1018_s29 = smov 8  }
  0x16   :  { %43 = dma.hbm_to_vmem [thread:$0]  %s1220_s1, 512, %s38_s20, [#allocation7], %s1017_s28, %s1017_s28, %s1018_s29  }
  0x17   :  { %s1019_s13 = smov [#allocation9]   ;;  %s1020_s15 = smov [#allocation3]  }
  0x18   :  { %s65_s14 = sshll.u32 %s1019_s13, 4  ;;  %s28_s16 = sshll.u32 %s1020_s15, 4  ;;  %s66_s14 = int_to_ptr.vmem [resolvable:$true] %s65_s14  ;;  %s29_s16 = int_to_ptr.vmem [resolvable:$true] %s28_s16 }
  0x19   :  { %s898_s19 = scalar_lea.hbm %s1224_s5, 1024 }
  0x1a   :  { %p899_p8 = scmp.ne.s32.totalorder %s1224_s5, %s898_s19  ;;  %p902_p9 = scmp.lt.u32.totalorder %s898_s19, %s1224_s5 }
  0x1c   :  { %p904_p10 = pnand %p902_p9, %p899_p8 }
  0x1e   :  { %907 = shalt.err (!%p904_p10)
}
  0x1f   :  { %s908_s1 = scalar_lea.vmem %s66_s14, 1024  ;;  %p913_p12 = scmp.lt.s32.totalorder %s66_s14, %s66_s14 }
  0x20   :  { %p909_p11 = scmp.ne.s32.totalorder %s66_s14, %s908_s1  ;;  %p914_p13 = scmp.lt.s32.totalorder %s908_s1, %s908_s1 }
  0x22   :  { %p915_p0 = por %p914_p13, %p913_p12 }
  0x24   :  { %p916_p1 = pnand %p915_p0, %p909_p11 }
  0x26   :  { %919 = shalt.err (!%p916_p1)
}
  0x27   :  { %s1021_s20 = smov 64   ;;  %s1022_s25 = smov 4  }
  0x28   :  { %71 = dma.hbm_to_vmem [thread:$0]  %s1224_s5, 1024, %s66_s14, [#allocation10], %s1021_s20, %s1021_s20, %s1022_s25  }
  0x29   :  { %s920_s29 = scalar_lea.hbm %s1219_s0, 128 }
  0x2a   :  { %p921_p2 = scmp.ne.s32.totalorder %s1219_s0, %s920_s29  ;;  %p924_p3 = scmp.lt.u32.totalorder %s920_s29, %s1219_s0 }
  0x2c   :  { %p926_p4 = pnand %p924_p3, %p921_p2 }
  0x2e   :  { %929 = shalt.err (!%p926_p4)
}
  0x2f   :  { %s930_s17 = scalar_lea.vmem %s29_s16, 128  ;;  %p935_p6 = scmp.lt.s32.totalorder %s29_s16, %s29_s16 }
  0x30   :  { %p931_p5 = scmp.ne.s32.totalorder %s29_s16, %s930_s17  ;;  %p936_p7 = scmp.lt.s32.totalorder %s930_s17, %s930_s17 }
  0x32   :  { %p937_p8 = por %p936_p7, %p935_p6 }
  0x34   :  { %p938_p9 = pnand %p937_p8, %p931_p5 }
  0x36   :  { %941 = shalt.err (!%p938_p9)
}
  0x37   :  { %31 = dma.hbm_to_vmem [thread:$0]  %s1219_s0, 128, %s29_s16, [#allocation4]  }
  0x38   :  { %s1023_s18 = smov [#allocation8]   ;;  %s1024_s21 = smov [#allocation11]  }
  0x39   :  { %s51_s19 = sshll.u32 %s1023_s18, 4  ;;  %s79_s22 = sshll.u32 %s1024_s21, 4  ;;  %s52_s19 = int_to_ptr.vmem [resolvable:$true] %s51_s19  ;;  %s80_s22 = int_to_ptr.vmem [resolvable:$true] %s79_s22 }
  0x3a   :  { %s942_s1 = scalar_lea.hbm %s1222_s3, 2048 }
  0x3b   :  { %p943_p10 = scmp.ne.s32.totalorder %s1222_s3, %s942_s1  ;;  %p946_p11 = scmp.lt.u32.totalorder %s942_s1, %s1222_s3 }
  0x3d   :  { %p948_p12 = pnand %p946_p11, %p943_p10 }
  0x3f   :  { %951 = shalt.err (!%p948_p12)
}
  0x40   :  { %s952_s0 = scalar_lea.vmem %s52_s19, 2048  ;;  %p957_p0 = scmp.lt.s32.totalorder %s52_s19, %s52_s19 }
  0x41   :  { %p953_p13 = scmp.ne.s32.totalorder %s52_s19, %s952_s0  ;;  %p958_p1 = scmp.lt.s32.totalorder %s952_s0, %s952_s0 }
  0x43   :  { %p959_p2 = por %p958_p1, %p957_p0 }
  0x45   :  { %p960_p3 = pnand %p959_p2, %p953_p13 }
  0x47   :  { %963 = shalt.err (!%p960_p3)
}
  0x48   :  { %57 = dma.hbm_to_vmem [thread:$0]  %s1222_s3, 2048, %s52_s19, [#allocation7], %s1021_s20, %s1021_s20, %s1022_s25  }
  0x49   :  { %s964_s13 = scalar_lea.hbm %s1226_s7, 1024 }
  0x4a   :  { %p965_p4 = scmp.ne.s32.totalorder %s1226_s7, %s964_s13  ;;  %p968_p5 = scmp.lt.u32.totalorder %s964_s13, %s1226_s7 }
  0x4c   :  { %p970_p6 = pnand %p968_p5, %p965_p4 }
  0x4e   :  { %973 = shalt.err (!%p970_p6)
}
  0x4f   :  { %s974_s18 = scalar_lea.vmem %s80_s22, 1024  ;;  %p979_p8 = scmp.lt.s32.totalorder %s80_s22, %s80_s22 }
  0x50   :  { %p975_p7 = scmp.ne.s32.totalorder %s80_s22, %s974_s18  ;;  %p980_p9 = scmp.lt.s32.totalorder %s974_s18, %s974_s18 }
  0x52   :  { %p981_p10 = por %p980_p9, %p979_p8 }
  0x54   :  { %p982_p11 = pnand %p981_p10, %p975_p7 }
  0x56   :  { %985 = shalt.err (!%p982_p11)
}
  0x57   :  { %85 = dma.hbm_to_vmem [thread:$0]  %s1226_s7, 1024, %s80_s22, [#allocation10], %s1021_s20, %s1021_s20, %s1022_s25  }
  0x58   :  { %1008 = dma.done.wait [#allocation4], 128  }
  0x59   :  { %1009 = vsyncadd [#allocation4], 4294967168 }
  0x5a   :  { %1010 = dma.done.wait [#allocation7], 2560  }
  0x5b   :  { %1011 = vsyncadd [#allocation7], 4294964736 }
  0x5c   :  { %1012 = dma.done.wait [#allocation10], 2048  }
  0x5d   :  { %1013 = vsyncadd [#allocation10], 4294965248  ;;  %v1025_v1 = vmov 0   ;;  %v838_v2 = vld [vmem:[#allocation6 + $0x4] ss:$8 sps:$4 sm:$0xff]   ;;  %v108_v6 = vld [vmem:[#allocation3] sm:$0xff]  ;;  %v116_v31 = vlaneseq }
  0x5e   :  { %182 = vmatprep.mubr.bf16.mxu0 %v1025_v1  ;;  %837 = vset.pattern.permute.xlu0 %v1025_v1  ;;  %v840_v3 = vld [vmem:[#allocation6] ss:$8 sps:$4 sm:$0xff]   ;;  %v841_v4 = vld [vmem:[#allocation6 + $0x14] ss:$8 sps:$4 sm:$0xff]   ;;  %v843_v5 = vld [vmem:[#allocation6 + $0x10] ss:$8 sps:$4 sm:$0xff]   ;;  %v109_v10 = vpack.c.bf16 %v108_v6, %v108_v6 }
  0x5f   :  { %150 = vmatprep.subr.bf16.mxu0 %v838_v2  ;;  %v844_v7 = vld [vmem:[#allocation8 + $0x40] sm:$0xff]   ;;  %v846_v9 = vld [vmem:[#allocation8 + $0x48] sm:$0xff]   ;;  %vm146_vm0 = vcmask 261120   ;;  %v848_v12 = vld [vmem:[#allocation8 + $0x50] sm:$0xff]   ;;  %v1026_v25 = vmov 0.0   ;;  %v1169_v32 = vshrl.u32 %v116_v31, 7 }
  0x60   :  { %151 = vmatpush1.bf16.msra.mxu0 %v840_v3  ;;  %v845_v8 = vld [vmem:[#allocation8] sm:$0xff]   ;;  %737 = vmatprep.subr.bf16.mxu1 %v844_v7  ;;  %v847_v11 = vld [vmem:[#allocation8 + $0x8] sm:$0xff]   ;;  %v849_v13 = vld [vmem:[#allocation8 + $0x10] sm:$0xff]   ;;  %vm1027_vm1 = vmmov 0   ;;  %s1028_s1 = smov [#allocation12]   ;;  %vm678_vm2 = vcmask 57344  }
  0x61   :  { %152 = vmatprep.subr.bf16.mxu0 %v841_v4  ;;  %738 = vmatpush3.bf16.msra.mxu1 %v845_v8  ;;  %v850_v14 = vld [vmem:[#allocation8 + $0x58] sm:$0xff]   ;;  %v852_v16 = vld [vmem:[#allocation8 + $0x60] sm:$0xff]   ;;  %v854_v18 = vld [vmem:[#allocation8 + $0x68] sm:$0xff]   ;;  %v118_v33 = vsub.s32 0, %v1169_v32  ;;  %v122_v35 = vsub.s32 1, %v1169_v32  ;;  %s686_s26 = sshll.u32 %s1028_s1, 4  ;;  %s687_s26 = int_to_ptr.vmem [resolvable:$true] %s686_s26 }
  0x62   :  { %739 = vmatprep.subr.bf16.mxu1 %v846_v9  ;;  %v851_v15 = vld [vmem:[#allocation8 + $0x18] sm:$0xff]   ;;  %v853_v17 = vld [vmem:[#allocation8 + $0x20] sm:$0xff]   ;;  %v855_v19 = vld [vmem:[#allocation8 + $0x28] sm:$0xff]   ;;  %s990_s27 = scalar_lea.vmem %s687_s26, 32  ;;  %p991_p13 = scmp.lt.s32.totalorder %s687_s26, %s687_s26 }
  0x63   :  { %v856_v20 = vld [vmem:[#allocation8 + $0x70] sm:$0xff]   ;;  %v858_v22 = vld [vmem:[#allocation8 + $0x78] sm:$0xff]   ;;  %v860_v24 = vld [vmem:[#allocation9] sm:$0xff]  }
  0x64   :  { %153 = vmatpush1.bf16.msra.mxu0 %v843_v5  ;;  %v857_v21 = vld [vmem:[#allocation8 + $0x30] sm:$0xff]   ;;  %v859_v23 = vld [vmem:[#allocation8 + $0x38] sm:$0xff]   ;;  %v861_v26 = vld [vmem:[#allocation9 + $0x8] sm:$0xff]  }
  0x65   :  { %740 = vmatpush3.bf16.msra.mxu1 %v847_v11  ;;  %779 = vmatprep.subr.bf16.mxu0 %v1026_v25  ;;  %v862_v27 = vld [vmem:[#allocation9 + $0x10] sm:$0xff]   ;;  %v863_v28 = vld [vmem:[#allocation9 + $0x18] sm:$0xff]   ;;  %v864_v29 = vld [vmem:[#allocation9 + $0x20] sm:$0xff]  }
  0x66   :  { %741 = vmatprep.subr.bf16.mxu1 %v848_v12  ;;  %v865_v30 = vld [vmem:[#allocation9 + $0x28] sm:$0xff]   ;;  %v114_v34 = vld [vmem:[%s1221_s2] sm:$0x3]  ;;  %v868_v50 = vld [vmem:[#allocation11] sm:$0xff]  }
  0x67   :  { %701 = vmatmul.mubr.msk.bf16.vlgmr.msra.gmra.mrb[0].mxu0 %vm146_vm0, %v109_v10  ;;  %v119_v36 = vrot.slane %v114_v34, %v118_v33  ;;  %v123_v37 = vrot.slane %v114_v34, %v122_v35  ;;  %v866_v48 = vld [vmem:[#allocation9 + $0x30] sm:$0xff]   ;;  %v867_v49 = vld [vmem:[#allocation9 + $0x38] sm:$0xff]   ;;  %v869_v51 = vld [vmem:[#allocation11 + $0x8] sm:$0xff]  }
  0x68   :  { %780 = vmatpush3.bf16.msra.mxu0 %v860_v24  ;;  %795 = vmatprep.mubr.msk.bf16.mxu0 %vm1027_vm1, %v1026_v25  ;;  %v870_v52 = vld [vmem:[#allocation11 + $0x10] sm:$0xff]   ;;  %v871_v53 = vld [vmem:[#allocation11 + $0x18] sm:$0xff]   ;;  %v872_v54 = vld [vmem:[#allocation11 + $0x20] sm:$0xff]  }
  0x69   :  { %742 = vmatpush3.bf16.msra.mxu1 %v849_v13  ;;  %781 = vmatprep.subr.bf16.mxu0 %v1026_v25  ;;  %v873_v55 = vld [vmem:[#allocation11 + $0x28] sm:$0xff]   ;;  %v702_v57 = vld [vmem:[%s1223_s4] ss:$0 sm:$0xff]  ;;  %v875_v2 = vld [vmem:[#allocation11 + $0x38] sm:$0xff]  }
  0x6a   :  { %743 = vmatprep.subr.bf16.mxu1 %v850_v14  ;;  %v874_v1 = vld [vmem:[#allocation11 + $0x30] sm:$0xff]  }
  0x6b   :  { %v719_v3 = vld [vmem:[%s1225_s6] ss:$0 sm:$0xff] }
  0x6c   :  { %782 = vmatpush3.bf16.msra.mxu0 %v861_v26  ;;  %v598_v11 = vld [vmem:[#allocation2] sm:$0x1] }
  0x6d   :  { %744 = vmatpush3.bf16.msra.mxu1 %v851_v15  ;;  %783 = vmatprep.subr.bf16.mxu0 %v1026_v25  ;;  %v728_v12 = vld [vmem:[%s1227_s8] ss:$0 sm:$0xff]  ;;  %s986_s8 = scalar_lea.vmem %s687_s26, 16 }
  0x6e   :  { %745 = vmatprep.subr.bf16.mxu1 %v852_v16  ;;  %601 = vperm.xlu0 %837, %v598_v11   ;;  %p987_p12 = scmp.ne.s32.totalorder %s687_s26, %s986_s8  ;;  %p992_p0 = scmp.lt.s32.totalorder %s990_s27, %s986_s8 }
  0x70   :  { %784 = vmatpush3.bf16.msra.mxu0 %v862_v27  ;;  %p993_p1 = por %p992_p0, %p991_p13 }
  0x71   :  { %746 = vmatpush3.bf16.msra.mxu1 %v853_v17  ;;  %785 = vmatprep.subr.bf16.mxu0 %v1026_v25 }
  0x72   :  { %747 = vmatprep.subr.bf16.mxu1 %v854_v18  ;;  %p994_p2 = pnand %p993_p1, %p987_p12 }
  0x74   :  { %786 = vmatpush3.bf16.msra.mxu0 %v863_v28 }
  0x75   :  { %748 = vmatpush3.bf16.msra.mxu1 %v855_v19  ;;  %787 = vmatprep.subr.bf16.mxu0 %v1026_v25  ;;  %v597_v19 = vld [vmem:[%s1228_s9] sm:$0x1] }
  0x76   :  { %749 = vmatprep.subr.bf16.mxu1 %v856_v20 }
  0x78   :  { %788 = vmatpush3.bf16.msra.mxu0 %v864_v29 }
  0x79   :  { %750 = vmatpush3.bf16.msra.mxu1 %v857_v21  ;;  %789 = vmatprep.subr.bf16.mxu0 %v1026_v25 }
  0x7a   :  { %751 = vmatprep.subr.bf16.mxu1 %v858_v22 }
  0x7c   :  { %790 = vmatpush3.bf16.msra.mxu0 %v865_v30 }
  0x7d   :  { %752 = vmatpush3.bf16.msra.mxu1 %v859_v23  ;;  %791 = vmatprep.subr.bf16.mxu0 %v1026_v25 }
  0x7e   :  { %799 = vmatprep.subr.bf16.mxu1 %v1026_v25 }
  0x80   :  { %792 = vmatpush3.bf16.msra.mxu0 %v866_v48 }
  0x81   :  { %793 = vmatprep.subr.bf16.mxu0 %v1026_v25 }
  0x84   :  { %794 = vmatpush3.bf16.msra.mxu0 %v867_v49 }
  0x85   :  { %819 = vmatprep.subr.mxu0 %v1026_v25 }
  0xed   :  { %v602_v20 = vpop.permute.xlu0 %601 }
  0xee   :  { %v607_v21 = vrot.slane %v602_v20, %v118_v33 }
 0x13a   :  { %v184_v38 = vpop.f32.mrb[0].mxu0 }
 0x13b   :  { %v185_v39 = vadd.f32 %v184_v38, %v119_v36  ;;  %v186_v40 = vpop.f32.mrb[1].mxu0 }
 0x13c   :  { %v187_v41 = vadd.f32 %v186_v40, %v123_v37  ;;  %v188_v42 = vpop.f32.mrb[2].mxu0 }
 0x13d   :  { %v191_v43 = vmax.f32 %v185_v39, 0.0  ;;  %v189_v44 = vpop.f32.mrb[3].mxu0 }
 0x13e   :  { %v192_v45 = vmax.f32 %v187_v41, 0.0 }
 0x13f   :  { %v193_v47 = vpack.c.bf16 %v191_v43, %v191_v43 }
 0x140   :  { %v194_v46 = vpack.c.bf16 %v192_v45, %v192_v45 }
 0x142   :  { %362 = vmatprep.mubr.bf16.mxu1 %v194_v46 }
 0x143   :  { %363 = vmatmul.mubr.bf16.vlgmr.msra.gmra.mrb[0].mxu1 %v193_v47 }
 0x144   :  { %815 = vmatprep.mubr.msk.bf16.mxu1 %vm1027_vm1, %v1026_v25  ;;  %800 = vmatpush3.bf16.msra.mxu1 %v868_v50 }
 0x145   :  { %801 = vmatprep.subr.bf16.mxu1 %v1026_v25 }
 0x148   :  { %802 = vmatpush3.bf16.msra.mxu1 %v869_v51 }
 0x149   :  { %803 = vmatprep.subr.bf16.mxu1 %v1026_v25 }
 0x14c   :  { %804 = vmatpush3.bf16.msra.mxu1 %v870_v52 }
 0x14d   :  { %805 = vmatprep.subr.bf16.mxu1 %v1026_v25 }
 0x150   :  { %806 = vmatpush3.bf16.msra.mxu1 %v871_v53 }
 0x151   :  { %807 = vmatprep.subr.bf16.mxu1 %v1026_v25 }
 0x154   :  { %808 = vmatpush3.bf16.msra.mxu1 %v872_v54 }
 0x155   :  { %809 = vmatprep.subr.bf16.mxu1 %v1026_v25 }
 0x158   :  { %810 = vmatpush3.bf16.msra.mxu1 %v873_v55 }
 0x159   :  { %811 = vmatprep.subr.bf16.mxu1 %v1026_v25 }
 0x15c   :  { %812 = vmatpush3.bf16.msra.mxu1 %v874_v1 }
 0x15d   :  { %813 = vmatprep.subr.bf16.mxu1 %v1026_v25 }
 0x160   :  { %814 = vmatpush3.bf16.msra.mxu1 %v875_v2 }
 0x216   :  { %v753_v56 = vpop.f32.mrb[0].mxu1 }
 0x217   :  { %v754_v58 = vpop.f32.mrb[1].mxu1 }
 0x218   :  { %v755_v59 = vadd.f32 %v754_v58, %v753_v56  ;;  %v756_v60 = vpop.f32.mrb[2].mxu1 }
 0x219   :  { %v757_v61 = vpop.f32.mrb[3].mxu1 }
 0x21a   :  { %v365_v62 = vadd.f32 %v755_v59, %v702_v57 }
 0x21c   :  { %v370_v63 = vmax.f32 %v365_v62, 0.0 }
 0x21e   :  { %v371_v0 = vpack.c.bf16 %v370_v63, %v370_v63 }
 0x220   :  { %796 = vmatmul.mubr.bf16.vlgmr.msra.gmra.mrb[4].mxu0 %v371_v0 }
 0x221   :  { %821 = vmatprep.mubr.msk.f32.mxu0 %vm1027_vm1, %v1026_v25 }
 0x2f3   :  { %v477_v4 = vpop.f32.mrb[4].mxu0 }
 0x2f4   :  { %v478_v5 = vadd.f32 %v719_v3, %v477_v4  ;;  %v797_v6 = vpop.f32.mrb[5].mxu0 }
 0x2f5   :  { %v480_v7 = vpop.f32.mrb[6].mxu0 }
 0x2f6   :  { %v483_v8 = vmax.f32 %v478_v5, 0.0  ;;  %v798_v9 = vpop.f32.mrb[7].mxu0 }
 0x2f8   :  { %v484_v10 = vpack.c.bf16 %v483_v8, %v483_v8 }
 0x2fa   :  { %816 = vmatmul.mubr.bf16.vlgmr.msra.gmra.mrb[4].mxu1 %v484_v10 }
 0x3cd   :  { %v590_v13 = vpop.f32.mrb[4].mxu1 }
 0x3ce   :  { %v591_v14 = vadd.f32 %v728_v12, %v590_v13  ;;  %v817_v15 = vpop.f32.mrb[5].mxu1 }
 0x3cf   :  { %v593_v16 = vpop.f32.mrb[6].mxu1 }
 0x3d0   :  { %v596_v17 = vmax.f32 %v591_v14, 0.0  ;;  %v818_v18 = vpop.f32.mrb[7].mxu1 }
 0x3d2   :  { %820 = vmatpush3.xpose.msra.mxu0 %v596_v17 }
 0x3d5   :  { %822 = vmatmul.mubr.f32.vlgmr.msra.gmra.mrb[8].mxu0 %v597_v19 }
 0x4a8   :  { %v674_v22 = vpop.f32.mrb[8].mxu0 }
 0x4a9   :  { %v675_v23 = vadd.f32 %v674_v22, %v607_v21  ;;  %v823_v24 = vpop.f32.mrb[9].mxu0 }
 0x4ab   :  { %679 = vst.msk [vmem:[#allocation12] sm:$0x1] %vm678_vm2, %v675_v23 }
 0x4ac   :  { %997 = shalt.err (!%p994_p2)
}
 0x4ad   :  { %s998_s28 = scalar_lea.hbm %s1230_s11, 16 }
 0x4ae   :  { %p999_p3 = scmp.ne.s32.totalorder %s1230_s11, %s998_s28  ;;  %p1002_p4 = scmp.lt.u32.totalorder %s998_s28, %s1230_s11 }
 0x4b0   :  { %p1004_p5 = pnand %p1002_p4, %p999_p3 }
 0x4b2   :  { %1007 = shalt.err (!%p1004_p5)
}
 0x4b3   :  { %689 = dma.vmem_to_hbm [thread:$0]  %s687_s26, 16, %s1230_s11, [#allocation5]  }
 0x4b4   :  { %1014 = dma.done.wait [#allocation5], 16  }
 0x4b5   :  { %1015 = vsyncadd [#allocation5], 4294967280 }
 0x4b6   :  { %693 = vsyncpa [#allocation4], 1 }
 0x4b7   :  { %694 = vsyncpa [#allocation7], 1 }
 0x4b8   :  { %695 = vsyncpa [#allocation10], 1 }
 0x4b9   :  { %696 = vsyncpa [#allocation5], 1 }

</bundles_post_ra>
